<compile_context>
chip_gen: v7x
topology: tpu7x:2x2x1
jax: 0.10.0
libtpu: 0.0.40
codegen_flags: <defaults>
</compile_context>

<pallas_src>
import jax
import jax.numpy as jnp
from jax import lax
from jax.experimental import pallas as pl
from jax.experimental.pallas import tpu as pltpu

EPS = 1e-12        # matches CoorsNorm.eps
ERROR_TOL = 1e-7   # matches max_min_norm error_tol


def _coors_norm_kernel(vec_ref, w_ref, out_ref):
    # vec_ref / out_ref: (3, H, TN) f32 ;  w_ref: (H, 1) f32
    v0 = vec_ref[0]                       # (H, TN)
    v1 = vec_ref[1]
    v2 = vec_ref[2]

    # ||vec|| over the spatial dim as three dense VPU mul/adds (no XLU reduce).
    sumsq = v0 * v0 + v1 * v1 + v2 * v2
    # clamp(sqrt(x), EPS) == sqrt(clamp(x, EPS**2)) (monotone); also guards rsqrt(0).
    sumsq = jnp.maximum(sumsq, EPS * EPS)
    inv_dist = lax.rsqrt(sumsq)           # EUP; replaces sqrt + per-element divide
    dist = sumsq * inv_dist               # == sqrt(sumsq), one extra multiply

    # Per-node max/min over the hidden (sublane) axis -> (1, TN).
    max_val = jnp.max(dist, axis=0, keepdims=True)
    min_val = jnp.min(dist, axis=0, keepdims=True)
    delta = max_val - min_val
    delta = jnp.where(delta < ERROR_TOL, 1.0, delta)

    # 1/delta: EUP reciprocal seed + 2 Newton steps (restores full f32 accuracy).
    # This runs on a (1, TN) slab only, so it is off the per-element hot path.
    inv_delta = pl.reciprocal(delta, approx=True)
    inv_delta = inv_delta * (2.0 - delta * inv_delta)
    inv_delta = inv_delta * (2.0 - delta * inv_delta)

    # dist_n >= 0 by construction, so the reference relu is a no-op (dropped).
    dist_n = (dist - min_val) * inv_delta         # (H, TN)

    # out = direct * dist_n * weight = vec * (inv_dist * dist_n * weight[h])
    scale = inv_dist * dist_n * w_ref[...]        # (H, TN); (H, 1) lane-broadcast
    out_ref[0] = (v0 * scale).astype(out_ref.dtype)
    out_ref[1] = (v1 * scale).astype(out_ref.dtype)
    out_ref[2] = (v2 * scale).astype(out_ref.dtype)


def _pick_tile_n(n: int, hidden: int, itemsize: int, vmem_budget_bytes: int) -> int:
    """Largest lane-aligned N-tile whose double-buffered in+out blocks fit the budget."""
    per_n = 2 * 2 * 3 * hidden * itemsize          # 2 buffers x (in + out) x (3, H) slab
    tile = max(128, min(2048, (vmem_budget_bytes // per_n) // 128 * 128))
    n_up = max(128, ((n + 127) // 128) * 128)      # don't pad a small N up to a huge tile
    return int(min(tile, n_up))


def coors_norm(vec: jax.Array, weight: jax.Array,
               *, vmem_budget_bytes: int = 24 * 1024 * 1024) -> jax.Array:
    """vec: [N, 3, H] float32, weight: [H] float32 -> [N, 3, H]."""
    N, S, H = vec.shape
    assert S == 3, "spatial/vector dim must be 3"

    tile_n = _pick_tile_n(N, H, jnp.dtype(vec.dtype).itemsize, vmem_budget_bytes)
    num_tiles = (N + tile_n - 1) // tile_n
    n_pad = num_tiles * tile_n

    # Lane-dense kernel layout: [3, H, N_pad]; zero-padding flows through as zeros.
    vec_t = jnp.transpose(vec, (1, 2, 0))
    if n_pad != N:
        vec_t = jnp.pad(vec_t, ((0, 0), (0, 0), (0, n_pad - N)))
    w = weight.reshape(H, 1).astype(vec.dtype)

    out_t = pl.pallas_call(
        _coors_norm_kernel,
        out_shape=jax.ShapeDtypeStruct((S, H, n_pad), vec.dtype),
        grid=(num_tiles,),
        in_specs=[
            pl.BlockSpec((S, H, tile_n), lambda i: (0, 0, i)),
            pl.BlockSpec((H, 1), lambda i: (0, 0)),
        ],
        out_specs=pl.BlockSpec((S, H, tile_n), lambda i: (0, 0, i)),
        compiler_params=pltpu.CompilerParams(
            dimension_semantics=("parallel",),       # shard N-tiles across TCs on v7x
            vmem_limit_bytes=32 * 1024 * 1024,       # safe on v5e/v6e/v7x; >= tile budget
        ),
    )(vec_t, w)

    out_t = out_t[:, :, :N]
    return jnp.transpose(out_t, (2, 0, 1))           # back to [N, 3, H]


def _coors_norm_ref(vec, weight):
    dist = jnp.sqrt(jnp.sum(vec * vec, axis=1, keepdims=True))
    dist = jnp.maximum(dist, EPS)
    direct = vec / dist
    max_val = jnp.max(dist, axis=-1, keepdims=True)
    min_val = jnp.min(dist, axis=-1, keepdims=True)
    delta = max_val - min_val
    delta = jnp.where(delta < ERROR_TOL, jnp.ones_like(delta), delta)
    dist_n = (dist - min_val) / delta
    out = jnp.maximum(dist_n, 0.0) * direct
    return out * weight[None, None, :]


if __name__ == "__main__":
    # Small shapes consistent with the module: 200 nodes (exercises N padding),
    # 3 spatial dims, hidden_channels = 32.
    N, S, H = 200, 3, 32

    key = jax.random.PRNGKey(0)
    vec = jax.random.normal(key, (N, S, H), dtype=jnp.float32)

    # Deterministic parameter init (CoorsNorm: weight = ones(hidden_channels)).
    weight = jnp.ones((H,), dtype=jnp.float32)

    out = jax.block_until_ready(coors_norm(vec, weight))
    ref = _coors_norm_ref(vec, weight)

    assert out.shape == (N, S, H)
    assert bool(jnp.allclose(out, ref, atol=1e-5, rtol=1e-5)), float(
        jnp.max(jnp.abs(out - ref)))

    print("KERNEL_OK")
</pallas_src>

<mosaic_0001>
module attributes {stable_mosaic.version = 11 : i64} {
  func.func @_coors_norm_kernel(%arg0: i32, %arg1: memref<3x32x256xf32, #tpu.memory_space<vmem>>, %arg2: memref<32x1xf32, #tpu.memory_space<vmem>>, %arg3: memref<3x32x256xf32, #tpu.memory_space<vmem>>) attributes {dimension_semantics = [#tpu.dimension_semantics<parallel>], iteration_bounds = array<i64: 1>, scalar_prefetch = 0 : i64, scratch_operands = 0 : i64, tpu.core_type = #tpu.core_type<tc>, window_params = [{transform_indices = @transform_0, window_bounds = array<i64: 3, 32, 256>}, {pipeline_mode = #tpu.pipeline_mode<synchronous>, transform_indices = @transform_1, window_bounds = array<i64: 32, 1>}, {transform_indices = @transform_2, window_bounds = array<i64: 3, 32, 256>}]} {
    %c0 = arith.constant 0 : index
    %c0_0 = arith.constant 0 : index
    %c0_1 = arith.constant 0 : index
    %0 = vector.load %arg1[%c0, %c0_0, %c0_1] : memref<3x32x256xf32, #tpu.memory_space<vmem>>, vector<1x32x256xf32>
    %1 = vector.shape_cast %0 : vector<1x32x256xf32> to vector<32x256xf32>
    %c1 = arith.constant 1 : index
    %c0_2 = arith.constant 0 : index
    %c0_3 = arith.constant 0 : index
    %2 = vector.load %arg1[%c1, %c0_2, %c0_3] : memref<3x32x256xf32, #tpu.memory_space<vmem>>, vector<1x32x256xf32>
    %3 = vector.shape_cast %2 : vector<1x32x256xf32> to vector<32x256xf32>
    %c2 = arith.constant 2 : index
    %c0_4 = arith.constant 0 : index
    %c0_5 = arith.constant 0 : index
    %4 = vector.load %arg1[%c2, %c0_4, %c0_5] : memref<3x32x256xf32, #tpu.memory_space<vmem>>, vector<1x32x256xf32>
    %5 = vector.shape_cast %4 : vector<1x32x256xf32> to vector<32x256xf32>
    %6 = arith.mulf %1, %1 : vector<32x256xf32>
    %7 = arith.mulf %3, %3 : vector<32x256xf32>
    %8 = arith.addf %6, %7 : vector<32x256xf32>
    %9 = arith.mulf %5, %5 : vector<32x256xf32>
    %10 = arith.addf %8, %9 : vector<32x256xf32>
    %cst = arith.constant 1.000000e-24 : f32
    %11 = vector.broadcast %cst : f32 to vector<32x256xf32>
    %12 = arith.maximumf %10, %11 : vector<32x256xf32>
    %13 = math.rsqrt %12 : vector<32x256xf32>
    %14 = arith.mulf %12, %13 : vector<32x256xf32>
    %cst_6 = arith.constant dense<0xFF800000> : vector<256xf32>
    %15 = vector.multi_reduction <maximumf>, %14, %cst_6 [0] : vector<32x256xf32> to vector<256xf32>
    %16 = vector.shape_cast %15 : vector<256xf32> to vector<1x256xf32>
    %cst_7 = arith.constant dense<0x7F800000> : vector<256xf32>
    %17 = vector.multi_reduction <minimumf>, %14, %cst_7 [0] : vector<32x256xf32> to vector<256xf32>
    %18 = vector.shape_cast %17 : vector<256xf32> to vector<1x256xf32>
    %19 = arith.subf %16, %18 : vector<1x256xf32>
    %cst_8 = arith.constant 1.000000e-07 : f32
    %20 = vector.broadcast %cst_8 : f32 to vector<1x256xf32>
    %21 = arith.cmpf olt, %19, %20 : vector<1x256xf32>
    %cst_9 = arith.constant 1.000000e+00 : f32
    %22 = vector.broadcast %cst_9 : f32 to vector<1x256xf32>
    %23 = arith.select %21, %22, %19 : vector<1x256xi1>, vector<1x256xf32>
    %24 = tpu.reciprocal %23 {approx = true} : vector<1x256xf32> -> vector<1x256xf32>
    %25 = arith.mulf %23, %24 : vector<1x256xf32>
    %cst_10 = arith.constant 2.000000e+00 : f32
    %26 = vector.broadcast %cst_10 : f32 to vector<1x256xf32>
    %27 = arith.subf %26, %25 : vector<1x256xf32>
    %28 = arith.mulf %24, %27 : vector<1x256xf32>
    %29 = arith.mulf %23, %28 : vector<1x256xf32>
    %cst_11 = arith.constant 2.000000e+00 : f32
    %30 = vector.broadcast %cst_11 : f32 to vector<1x256xf32>
    %31 = arith.subf %30, %29 : vector<1x256xf32>
    %32 = arith.mulf %28, %31 : vector<1x256xf32>
    %33 = vector.broadcast %18 : vector<1x256xf32> to vector<32x256xf32>
    %34 = arith.subf %14, %33 : vector<32x256xf32>
    %35 = vector.broadcast %32 : vector<1x256xf32> to vector<32x256xf32>
    %36 = arith.mulf %34, %35 : vector<32x256xf32>
    %37 = arith.mulf %13, %36 : vector<32x256xf32>
    %c0_12 = arith.constant 0 : index
    %c0_13 = arith.constant 0 : index
    %38 = vector.load %arg2[%c0_12, %c0_13] : memref<32x1xf32, #tpu.memory_space<vmem>>, vector<32x1xf32>
    %39 = vector.broadcast %38 : vector<32x1xf32> to vector<32x256xf32>
    %40 = arith.mulf %37, %39 : vector<32x256xf32>
    %41 = arith.mulf %1, %40 : vector<32x256xf32>
    %c0_14 = arith.constant 0 : index
    %c0_15 = arith.constant 0 : index
    %c0_16 = arith.constant 0 : index
    %42 = vector.load %arg3[%c0_14, %c0_15, %c0_16] : memref<3x32x256xf32, #tpu.memory_space<vmem>>, vector<1x32x256xf32>
    %43 = vector.shape_cast %42 : vector<1x32x256xf32> to vector<32x256xf32>
    %44 = vector.shape_cast %41 : vector<32x256xf32> to vector<1x32x256xf32>
    tpu.vector_store %arg3[%c0_14, %c0_15, %c0_16], %44 {strides = array<i32>} : memref<3x32x256xf32, #tpu.memory_space<vmem>>, vector<1x32x256xf32>,
    %45 = arith.mulf %3, %40 : vector<32x256xf32>
    %c1_17 = arith.constant 1 : index
    %c0_18 = arith.constant 0 : index
    %c0_19 = arith.constant 0 : index
    %46 = vector.load %arg3[%c1_17, %c0_18, %c0_19] : memref<3x32x256xf32, #tpu.memory_space<vmem>>, vector<1x32x256xf32>
    %47 = vector.shape_cast %46 : vector<1x32x256xf32> to vector<32x256xf32>
    %48 = vector.shape_cast %45 : vector<32x256xf32> to vector<1x32x256xf32>
    tpu.vector_store %arg3[%c1_17, %c0_18, %c0_19], %48 {strides = array<i32>} : memref<3x32x256xf32, #tpu.memory_space<vmem>>, vector<1x32x256xf32>,
    %49 = arith.mulf %5, %40 : vector<32x256xf32>
    %c2_20 = arith.constant 2 : index
    %c0_21 = arith.constant 0 : index
    %c0_22 = arith.constant 0 : index
    %50 = vector.load %arg3[%c2_20, %c0_21, %c0_22] : memref<3x32x256xf32, #tpu.memory_space<vmem>>, vector<1x32x256xf32>
    %51 = vector.shape_cast %50 : vector<1x32x256xf32> to vector<32x256xf32>
    %52 = vector.shape_cast %49 : vector<32x256xf32> to vector<1x32x256xf32>
    tpu.vector_store %arg3[%c2_20, %c0_21, %c0_22], %52 {strides = array<i32>} : memref<3x32x256xf32, #tpu.memory_space<vmem>>, vector<1x32x256xf32>,
    return
  }
  func.func @transform_0(%arg0: i32) -> (i32, i32, i32) {
    %c0_i32 = arith.constant 0 : i32
    %c0_i32_0 = arith.constant 0 : i32
    %c0_i32_1 = arith.constant 0 : i32
    return %c0_i32, %c0_i32_0, %arg0 : i32, i32, i32
  }
  func.func @transform_1(%arg0: i32) -> (i32, i32) {
    %c0_i32 = arith.constant 0 : i32
    %c0_i32_0 = arith.constant 0 : i32
    %c0_i32_1 = arith.constant 0 : i32
    return %c0_i32, %c0_i32_0 : i32, i32
  }
  func.func @transform_2(%arg0: i32) -> (i32, i32, i32) {
    %c0_i32 = arith.constant 0 : i32
    %c0_i32_0 = arith.constant 0 : i32
    %c0_i32_1 = arith.constant 0 : i32
    return %c0_i32, %c0_i32_0, %arg0 : i32, i32, i32
  }
}

</mosaic_0001>

<bundles_post_ra>
// kernel: tpu_custom_call.1
= control target key start
LH: loop header
LB: loop body
LE: loop exit
PB: predicated region body
PF: predicated region fallthrough
CT: control target
= control target key end

     0   :  { %7 = vsyncpa [#allocation3], 0  ;;  %s624_s0 = inlined_call_operand.hbm [shape: f32[3,32,256], index: 0, kind: input, shape index: {}]   ;;  %s625_s1 = inlined_call_operand.vmem [shape: f32[32,1], index: 1, kind: input, shape index: {}]   ;;  %s626_s2 = inlined_call_operand.hbm [shape: f32[3,32,256], index: 2, kind: output, shape index: {}]  }
   0x1   :  { %8 = vsyncpa [#allocation4], 0  ;;  %s370_s9 = smov [#allocation2]   ;;  %s322_s13 = scalar_lea.hbm %s624_s0, 3072 }
   0x2   :  { %s14_s10 = sshll.u32 %s370_s9, 4  ;;  %p323_p0 = scmp.ne.s32.totalorder %s624_s0, %s322_s13  ;;  %s15_s10 = int_to_ptr.vmem [resolvable:$true] %s14_s10 }
   0x3   :  { %p326_p1 = scmp.lt.u32.totalorder %s322_s13, %s624_s0 }
   0x5   :  { %p328_p2 = pnand %p326_p1, %p323_p0 }
   0x7   :  { %331 = shalt.err (!%p328_p2)
}
   0x8   :  { %s332_s18 = scalar_lea.vmem %s15_s10, 3072  ;;  %p337_p4 = scmp.lt.s32.totalorder %s15_s10, %s15_s10 }
   0x9   :  { %p333_p3 = scmp.ne.s32.totalorder %s15_s10, %s332_s18  ;;  %p338_p5 = scmp.lt.s32.totalorder %s332_s18, %s332_s18 }
   0xb   :  { %p339_p6 = por %p338_p5, %p337_p4 }
   0xd   :  { %p340_p7 = pnand %p339_p6, %p333_p3 }
   0xf   :  { %343 = shalt.err (!%p340_p7)
}
  0x10   :  { %s371_s19 = smov 256   ;;  %s372_s20 = smov 16  }
  0x11   :  { %20 = dma.hbm_to_vmem [thread:$0]  %s624_s0, 3072, %s15_s10, [#allocation3], %s371_s19, %s371_s19, %s372_s20  }
  0x12   :  { %366 = dma.done.wait [#allocation3], 3072  }
  0x13   :  { %367 = vsyncadd [#allocation3], 4294964224  ;;  %v373_v0 = vmov 0   ;;  %v198_v1 = vld [vmem:[%s625_s1 + $0x10] sm:$0xff]  ;;  %v196_v2 = vld [vmem:[%s625_s1] sm:$0xff] }
  0x14   :  { %301 = vset.pattern.permute.xlu1 %v373_v0  ;;  %300 = vset.pattern.permute.xlu0 %v373_v0  ;;  %v199_v3 = vld [vmem:[%s625_s1 + $0x18] sm:$0xff]  ;;  %v197_v4 = vld [vmem:[%s625_s1 + $0x8] sm:$0xff]  ;;  %v417_v5 = vld [vmem:[#allocation2] sm:$0xff]  ;;  %s374_s1 = smov [#allocation5]  }
  0x15   :  { %212 = vperm.xlu1 %301, %v198_v1   ;;  %202 = vperm.xlu0 %300, %v196_v2   ;;  %v419_v6 = vld [vmem:[#allocation2 + $0x8] sm:$0xff]  ;;  %v421_v7 = vld [vmem:[#allocation2 + $0x10] sm:$0xff]  ;;  %v423_v8 = vld [vmem:[#allocation2 + $0x18] sm:$0xff]  ;;  %v52_v13 = vmul.f32 %v417_v5, %v417_v5  ;;  %s283_s30 = sshll.u32 %s374_s1, 4  ;;  %s284_s30 = int_to_ptr.vmem [resolvable:$true] %s283_s30 }
  0x16   :  { %v425_v9 = vld [vmem:[#allocation2 + $0x20] sm:$0xff]  ;;  %v427_v10 = vld [vmem:[#allocation2 + $0x28] sm:$0xff]  ;;  %v429_v11 = vld [vmem:[#allocation2 + $0x30] sm:$0xff]  ;;  %v53_v14 = vmul.f32 %v419_v6, %v419_v6  ;;  %v54_v18 = vmul.f32 %v421_v7, %v421_v7  ;;  %v55_v19 = vmul.f32 %v423_v8, %v423_v8  ;;  %s344_s3 = scalar_lea.vmem %s284_s30, 3072  ;;  %p349_p9 = scmp.lt.s32.totalorder %s284_s30, %s284_s30 }
  0x17   :  { %v431_v12 = vld [vmem:[#allocation2 + $0x38] sm:$0xff]  ;;  %v437_v15 = vld [vmem:[#allocation2 + $0x40] sm:$0xff]  ;;  %v439_v16 = vld [vmem:[#allocation2 + $0x48] sm:$0xff]  ;;  %v56_v29 = vmul.f32 %v425_v9, %v425_v9  ;;  %v57_v35 = vmul.f32 %v427_v10, %v427_v10  ;;  %v58_v41 = vmul.f32 %v429_v11, %v429_v11  ;;  %p345_p8 = scmp.ne.s32.totalorder %s284_s30, %s344_s3  ;;  %p350_p10 = scmp.lt.s32.totalorder %s344_s3, %s344_s3 }
  0x18   :  { %v441_v17 = vld [vmem:[#allocation2 + $0x50] sm:$0xff]  ;;  %v447_v20 = vld [vmem:[#allocation2 + $0x58] sm:$0xff]  ;;  %v449_v21 = vld [vmem:[#allocation2 + $0x60] sm:$0xff]  ;;  %v60_v23 = vmul.f32 %v437_v15, %v437_v15  ;;  %v61_v24 = vmul.f32 %v439_v16, %v439_v16  ;;  %v59_v42 = vmul.f32 %v431_v12, %v431_v12 }
  0x19   :  { %631 = vst [vmem:[#allocation8_spill] sm:$0xff] %v441_v17  ;;  %217 = vperm.xlu1 %301, %v199_v3   ;;  %207 = vperm.xlu0 %300, %v197_v4   ;;  %632 = vst [vmem:[#allocation9_spill] sm:$0xff] %v447_v20  ;;  %v451_v22 = vld [vmem:[#allocation2 + $0x68] sm:$0xff]  ;;  %v62_v25 = vmul.f32 %v441_v17, %v441_v17  ;;  %v459_v26 = vld [vmem:[#allocation2 + $0x70] sm:$0xff]  ;;  %v63_v30 = vmul.f32 %v447_v20, %v447_v20  ;;  %p351_p11 = por %p350_p10, %p349_p9 }
  0x1a   :  { %v461_v27 = vld [vmem:[#allocation2 + $0x78] sm:$0xff]  ;;  %v463_v28 = vld [vmem:[#allocation2 + $0x80] sm:$0xff]  ;;  %v64_v31 = vmul.f32 %v449_v21, %v449_v21  ;;  %v471_v32 = vld [vmem:[#allocation2 + $0x88] sm:$0xff]  ;;  %v65_v36 = vmul.f32 %v451_v22, %v451_v22  ;;  %v68_v37 = vadd.f32 %v60_v23, %v52_v13  ;;  %v69_v38 = vadd.f32 %v61_v24, %v53_v14 }
  0x1b   :  { %v473_v33 = vld [vmem:[#allocation2 + $0x90] sm:$0xff]  ;;  %v475_v34 = vld [vmem:[#allocation2 + $0x98] sm:$0xff]  ;;  %v481_v39 = vld [vmem:[#allocation2 + $0xa0] sm:$0xff]  ;;  %v66_v43 = vmul.f32 %v459_v26, %v459_v26  ;;  %v70_v44 = vadd.f32 %v62_v25, %v54_v18  ;;  %v67_v46 = vmul.f32 %v461_v27, %v461_v27  ;;  %v71_v47 = vadd.f32 %v63_v30, %v55_v19  ;;  %p352_p12 = pnand %p351_p11, %p345_p8 }
  0x1c   :  { %633 = vst [vmem:[#allocation10_spill] sm:$0xff] %v473_v33  ;;  %634 = vst [vmem:[#allocation11_spill] sm:$0xff] %v475_v34  ;;  %v483_v40 = vld [vmem:[#allocation2 + $0xa8] sm:$0xff]  ;;  %v491_v45 = vld [vmem:[#allocation2 + $0xb0] sm:$0xff]  ;;  %v76_v48 = vmul.f32 %v463_v28, %v463_v28  ;;  %v77_v49 = vmul.f32 %v471_v32, %v471_v32  ;;  %v72_v51 = vadd.f32 %v64_v31, %v56_v29 }
  0x1d   :  { %v499_v50 = vld [vmem:[#allocation2 + $0xb8] sm:$0xff]  ;;  %v78_v52 = vmul.f32 %v473_v33, %v473_v33  ;;  %v79_v53 = vmul.f32 %v475_v34, %v475_v34  ;;  %v80_v54 = vmul.f32 %v481_v39, %v481_v39  ;;  %v73_v55 = vadd.f32 %v65_v36, %v57_v35 }
  0x1e   :  { %v81_v56 = vmul.f32 %v483_v40, %v483_v40  ;;  %v84_v57 = vadd.f32 %v76_v48, %v68_v37  ;;  %v85_v58 = vadd.f32 %v77_v49, %v69_v38  ;;  %v74_v59 = vadd.f32 %v66_v43, %v58_v41 }
  0x1f   :  { %v82_v60 = vmul.f32 %v491_v45, %v491_v45  ;;  %v86_v61 = vadd.f32 %v78_v52, %v70_v44  ;;  %v75_v62 = vadd.f32 %v67_v46, %v59_v42  ;;  %v83_v63 = vmul.f32 %v499_v50, %v499_v50 }
  0x20   :  { %v87_v0 = vadd.f32 %v79_v53, %v71_v47  ;;  %v88_v1 = vadd.f32 %v80_v54, %v72_v51  ;;  %v92_v2 = vmax.f32 %v84_v57, 1e-24  ;;  %v89_v3 = vadd.f32 %v81_v56, %v73_v55 }
  0x21   :  { %v93_v4 = vmax.f32 %v85_v58, 1e-24  ;;  %v90_v13 = vadd.f32 %v82_v60, %v74_v59  ;;  %v94_v14 = vmax.f32 %v86_v61, 1e-24  ;;  %v91_v18 = vadd.f32 %v83_v63, %v75_v62 }
  0x22   :  { %v95_v19 = vmax.f32 %v87_v0, 1e-24  ;;  %v96_v23 = vmax.f32 %v88_v1, 1e-24  ;;  %302 = vrsqrt.f32 %v92_v2  ;;  %v97_v24 = vmax.f32 %v89_v3, 1e-24 }
  0x23   :  { %304 = vrsqrt.f32 %v93_v4  ;;  %v98_v25 = vmax.f32 %v90_v13, 1e-24  ;;  %v99_v29 = vmax.f32 %v91_v18, 1e-24 }
  0x24   :  { %306 = vrsqrt.f32 %v94_v14 }
  0x25   :  { %308 = vrsqrt.f32 %v95_v19 }
  0x26   :  { %310 = vrsqrt.f32 %v96_v23 }
  0x27   :  { %312 = vrsqrt.f32 %v97_v24 }
  0x28   :  { %314 = vrsqrt.f32 %v98_v25 }
  0x29   :  { %316 = vrsqrt.f32 %v99_v29 }
  0x2c   :  { %v513_v30 = vpop.eup %302 }
  0x2d   :  { %v515_v31 = vpop.eup %304  ;;  %v530_v43 = vmul.f32 %v513_v30, %v92_v2 }
  0x2e   :  { %v517_v35 = vpop.eup %306  ;;  %v542_v48 = vmul.f32 %v515_v31, %v93_v4 }
  0x2f   :  { %v519_v36 = vpop.eup %308  ;;  %v533_v44 = vmul.f32 %v517_v35, %v94_v14 }
  0x30   :  { %v521_v37 = vpop.eup %310  ;;  %v545_v49 = vmul.f32 %v519_v36, %v95_v19 }
  0x31   :  { %v523_v38 = vpop.eup %312  ;;  %v536_v46 = vmul.f32 %v521_v37, %v96_v23 }
  0x32   :  { %v525_v41 = vpop.eup %314  ;;  %v548_v51 = vmul.f32 %v523_v38, %v97_v24 }
  0x33   :  { %v527_v42 = vpop.eup %316  ;;  %v539_v47 = vmul.f32 %v525_v41, %v98_v25  ;;  %v116_v53 = vmax.f32 %v530_v43, %v536_v46  ;;  %v134_v55 = vmin.f32 %v530_v43, %v536_v46 }
  0x34   :  { %v551_v52 = vmul.f32 %v527_v42, %v99_v29  ;;  %v125_v57 = vmax.f32 %v542_v48, %v548_v51  ;;  %v143_v59 = vmin.f32 %v542_v48, %v548_v51 }
  0x35   :  { %v117_v54 = vmax.f32 %v533_v44, %v539_v47  ;;  %v135_v56 = vmin.f32 %v533_v44, %v539_v47 }
  0x36   :  { %v126_v58 = vmax.f32 %v545_v49, %v551_v52  ;;  %v144_v60 = vmin.f32 %v545_v49, %v551_v52 }
  0x37   :  { %v118_v61 = vmax.f32 %v116_v53, %v117_v54  ;;  %v136_v62 = vmin.f32 %v134_v55, %v135_v56 }
  0x38   :  { %v127_v63 = vmax.f32 %v125_v57, %v126_v58  ;;  %v145_v0 = vmin.f32 %v143_v59, %v144_v60 }
  0x39   :  { %v119_v1 = vrot.slane %v118_v61, 4  ;;  %v137_v2 = vrot.slane %v136_v62, 4 }
  0x3a   :  { %v128_v3 = vrot.slane %v127_v63, 4  ;;  %v146_v4 = vrot.slane %v145_v0, 4 }
  0x3b   :  { %v120_v13 = vmax.f32 %v118_v61, %v119_v1  ;;  %v138_v14 = vmin.f32 %v136_v62, %v137_v2 }
  0x3c   :  { %v129_v18 = vmax.f32 %v127_v63, %v128_v3  ;;  %v147_v19 = vmin.f32 %v145_v0, %v146_v4 }
  0x3d   :  { %v121_v23 = vrot.slane %v120_v13, 2  ;;  %v139_v24 = vrot.slane %v138_v14, 2 }
  0x3e   :  { %v130_v25 = vrot.slane %v129_v18, 2  ;;  %v148_v29 = vrot.slane %v147_v19, 2 }
  0x3f   :  { %v122_v34 = vmax.f32 %v120_v13, %v121_v23  ;;  %v140_v33 = vmin.f32 %v138_v14, %v139_v24 }
  0x40   :  { %v131_v20 = vmax.f32 %v129_v18, %v130_v25  ;;  %v149_v17 = vmin.f32 %v147_v19, %v148_v29 }
  0x41   :  { %v123_v53 = vrot.slane %v122_v34, 1  ;;  %v141_v54 = vrot.slane %v140_v33, 1 }
  0x42   :  { %v132_v55 = vrot.slane %v131_v20, 1  ;;  %v150_v56 = vrot.slane %v149_v17, 1 }
  0x43   :  { %v124_v57 = vmax.f32 %v122_v34, %v123_v53  ;;  %v142_v58 = vmin.f32 %v140_v33, %v141_v54 }
  0x44   :  { %v133_v59 = vmax.f32 %v131_v20, %v132_v55  ;;  %v151_v60 = vmin.f32 %v149_v17, %v150_v56 }
  0x45   :  { %v152_v61 = vsub.f32 %v124_v57, %v142_v58  ;;  %v176_v23 = vsub.f32 %v536_v46, %v142_v58  ;;  %v172_v24 = vsub.f32 %v530_v43, %v142_v58 }
  0x46   :  { %v153_v62 = vsub.f32 %v133_v59, %v151_v60  ;;  %v177_v53 = vsub.f32 %v548_v51, %v151_v60  ;;  %v173_v54 = vsub.f32 %v542_v48, %v151_v60  ;;  %v175_v46 = vsub.f32 %v545_v49, %v151_v60 }
  0x47   :  { %vm154_vm0 = vcmp.lt.f32.partialorder %v152_v61, 1e-07 }
  0x48   :  { %vm155_vm1 = vcmp.lt.f32.partialorder %v153_v62, 1e-07  ;;  %v156_v63 = vsel %vm154_vm0, 1.0, %v152_v61  ;;  %v178_v61 = vsub.f32 %v539_v47, %v142_v58 }
  0x49   :  { %v157_v0 = vsel %vm155_vm1, 1.0, %v153_v62  ;;  %318 = vrcp.f32 %v156_v63  ;;  %v179_v62 = vsub.f32 %v551_v52, %v151_v60 }
  0x4a   :  { %320 = vrcp.f32 %v157_v0 }
  0x53   :  { %v319_v1 = vpop.eup %318 }
  0x54   :  { %v321_v2 = vpop.eup %320  ;;  %v160_v3 = vmul.f32 %v319_v1, %v156_v63 }
  0x55   :  { %v161_v4 = vmul.f32 %v321_v2, %v157_v0 }
  0x56   :  { %v162_v13 = vsub.f32 2.0, %v160_v3 }
  0x57   :  { %v163_v14 = vsub.f32 2.0, %v161_v4 }
  0x58   :  { %v164_v18 = vmul.f32 %v319_v1, %v162_v13 }
  0x59   :  { %v165_v19 = vmul.f32 %v321_v2, %v163_v14 }
  0x5a   :  { %v166_v34 = vmul.f32 %v164_v18, %v156_v63  ;;  %v174_v63 = vsub.f32 %v533_v44, %v142_v58 }
  0x5b   :  { %v167_v33 = vmul.f32 %v165_v19, %v157_v0 }
  0x5c   :  { %v168_v20 = vsub.f32 2.0, %v166_v34 }
  0x5d   :  { %v169_v17 = vsub.f32 2.0, %v167_v33 }
  0x5e   :  { %v170_v25 = vmul.f32 %v168_v20, %v164_v18 }
  0x5f   :  { %v171_v29 = vmul.f32 %v169_v17, %v165_v19 }
  0x60   :  { %v184_v55 = vmul.f32 %v176_v23, %v170_v25  ;;  %v180_v57 = vmul.f32 %v172_v24, %v170_v25  ;;  %v186_v1 = vmul.f32 %v178_v61, %v170_v25  ;;  %v182_v3 = vmul.f32 %v174_v63, %v170_v25  ;;  %v635_v25 = vld [vmem:[#allocation8_spill] sm:$0xff] }
  0x61   :  { %v185_v56 = vmul.f32 %v177_v53, %v171_v29  ;;  %v181_v59 = vmul.f32 %v173_v54, %v171_v29  ;;  %v187_v2 = vmul.f32 %v179_v62, %v171_v29  ;;  %v183_v4 = vmul.f32 %v175_v46, %v171_v29  ;;  %v636_v29 = vld [vmem:[#allocation9_spill] sm:$0xff]  ;;  %v637_v53 = vld [vmem:[#allocation10_spill] sm:$0xff]  ;;  %v638_v54 = vld [vmem:[#allocation11_spill] sm:$0xff] }
  0x62   :  { %v192_v43 = vmul.f32 %v521_v37, %v184_v55  ;;  %v188_v51 = vmul.f32 %v513_v30, %v180_v57  ;;  %v194_v49 = vmul.f32 %v525_v41, %v186_v1 }
  0x63   :  { %v193_v0 = vmul.f32 %v523_v38, %v185_v56  ;;  %v189_v48 = vmul.f32 %v515_v31, %v181_v59  ;;  %v195_v37 = vmul.f32 %v527_v42, %v187_v2  ;;  %v190_v38 = vmul.f32 %v517_v35, %v182_v3 }
  0x64   :  { %v191_v30 = vmul.f32 %v519_v36, %v183_v4 }
  0x94   :  { %v213_v13 = vpop.permute.xlu1 %212  ;;  %v203_v47 = vpop.permute.xlu0 %202 }
  0x95   :  { %v224_v14 = vmul.f32 %v213_v13, %v192_v43  ;;  %v225_v52 = vmul.f32 %v213_v13, %v193_v0  ;;  %v220_v18 = vmul.f32 %v203_v47, %v188_v51  ;;  %v221_v44 = vmul.f32 %v203_v47, %v189_v48 }
  0x97   :  { %v232_v31 = vmul.f32 %v224_v14, %v425_v9  ;;  %v233_v58 = vmul.f32 %v225_v52, %v427_v10  ;;  %v248_v60 = vmul.f32 %v224_v14, %v449_v21  ;;  %v249_v19 = vmul.f32 %v225_v52, %v451_v22 }
  0x98   :  { %v265_v34 = vmul.f32 %v224_v14, %v481_v39  ;;  %v266_v33 = vmul.f32 %v225_v52, %v483_v40  ;;  %v228_v41 = vmul.f32 %v220_v18, %v417_v5  ;;  %v229_v42 = vmul.f32 %v221_v44, %v419_v6  ;;  %v218_v20 = vpop.permute.xlu1 %217  ;;  %v208_v35 = vpop.permute.xlu0 %207 }
  0x99   :  { %240 = vst [vmem:[#allocation5 + $0x20] sm:$0xff] %v232_v31  ;;  %241 = vst [vmem:[#allocation5 + $0x28] sm:$0xff] %v233_v58  ;;  %v244_v9 = vmul.f32 %v220_v18, %v437_v15  ;;  %v245_v10 = vmul.f32 %v221_v44, %v439_v16  ;;  %v261_v21 = vmul.f32 %v220_v18, %v463_v28 }
  0x9a   :  { %257 = vst [vmem:[#allocation5 + $0x60] sm:$0xff] %v248_v60  ;;  %258 = vst [vmem:[#allocation5 + $0x68] sm:$0xff] %v249_v19  ;;  %v262_v22 = vmul.f32 %v221_v44, %v471_v32  ;;  %v226_v5 = vmul.f32 %v218_v20, %v194_v49  ;;  %v227_v6 = vmul.f32 %v218_v20, %v195_v37 }
  0x9b   :  { %274 = vst [vmem:[#allocation5 + $0xa0] sm:$0xff] %v265_v34  ;;  %275 = vst [vmem:[#allocation5 + $0xa8] sm:$0xff] %v266_v33  ;;  %v222_v39 = vmul.f32 %v208_v35, %v190_v38  ;;  %v223_v40 = vmul.f32 %v208_v35, %v191_v30 }
  0x9c   :  { %236 = vst [vmem:[#allocation5] sm:$0xff] %v228_v41  ;;  %237 = vst [vmem:[#allocation5 + $0x8] sm:$0xff] %v229_v42  ;;  %v234_v15 = vmul.f32 %v226_v5, %v429_v11  ;;  %v235_v16 = vmul.f32 %v227_v6, %v431_v12  ;;  %v250_v28 = vmul.f32 %v226_v5, %v459_v26 }
  0x9d   :  { %253 = vst [vmem:[#allocation5 + $0x40] sm:$0xff] %v244_v9  ;;  %254 = vst [vmem:[#allocation5 + $0x48] sm:$0xff] %v245_v10  ;;  %v251_v32 = vmul.f32 %v227_v6, %v461_v27  ;;  %v267_v36 = vmul.f32 %v226_v5, %v491_v45  ;;  %v268_v17 = vmul.f32 %v227_v6, %v499_v50 }
  0x9e   :  { %270 = vst [vmem:[#allocation5 + $0x80] sm:$0xff] %v261_v21  ;;  %271 = vst [vmem:[#allocation5 + $0x88] sm:$0xff] %v262_v22  ;;  %v230_v23 = vmul.f32 %v222_v39, %v421_v7  ;;  %v231_v24 = vmul.f32 %v223_v40, %v423_v8  ;;  %v246_v11 = vmul.f32 %v222_v39, %v635_v25 }
  0x9f   :  { %242 = vst [vmem:[#allocation5 + $0x30] sm:$0xff] %v234_v15  ;;  %243 = vst [vmem:[#allocation5 + $0x38] sm:$0xff] %v235_v16  ;;  %v247_v12 = vmul.f32 %v223_v40, %v636_v29  ;;  %v263_v26 = vmul.f32 %v222_v39, %v637_v53  ;;  %v264_v27 = vmul.f32 %v223_v40, %v638_v54 }
  0xa0   :  { %259 = vst [vmem:[#allocation5 + $0x70] sm:$0xff] %v250_v28  ;;  %260 = vst [vmem:[#allocation5 + $0x78] sm:$0xff] %v251_v32 }
  0xa1   :  { %276 = vst [vmem:[#allocation5 + $0xb0] sm:$0xff] %v267_v36  ;;  %277 = vst [vmem:[#allocation5 + $0xb8] sm:$0xff] %v268_v17 }
  0xa2   :  { %238 = vst [vmem:[#allocation5 + $0x10] sm:$0xff] %v230_v23  ;;  %239 = vst [vmem:[#allocation5 + $0x18] sm:$0xff] %v231_v24 }
  0xa3   :  { %255 = vst [vmem:[#allocation5 + $0x50] sm:$0xff] %v246_v11  ;;  %256 = vst [vmem:[#allocation5 + $0x58] sm:$0xff] %v247_v12 }
  0xa4   :  { %272 = vst [vmem:[#allocation5 + $0x90] sm:$0xff] %v263_v26  ;;  %273 = vst [vmem:[#allocation5 + $0x98] sm:$0xff] %v264_v27 }
  0xa5   :  { %355 = shalt.err (!%p352_p12)
}
  0xa6   :  { %s356_s6 = scalar_lea.hbm %s626_s2, 3072 }
  0xa7   :  { %p357_p13 = scmp.ne.s32.totalorder %s626_s2, %s356_s6  ;;  %p360_p0 = scmp.lt.u32.totalorder %s356_s6, %s626_s2 }
  0xa9   :  { %p362_p1 = pnand %p360_p0, %p357_p13 }
  0xab   :  { %365 = shalt.err (!%p362_p1)
}
  0xac   :  { %289 = dma.vmem_to_hbm [thread:$0]  %s284_s30, 3072, %s626_s2, [#allocation4], %s371_s19, %s371_s19, %s372_s20  }
  0xad   :  { %368 = dma.done.wait [#allocation4], 3072  }
  0xae   :  { %369 = vsyncadd [#allocation4], 4294964224 }
  0xaf   :  { %293 = vsyncpa [#allocation3], 1 }
  0xb0   :  { %294 = vsyncpa [#allocation4], 1 }

</bundles_post_ra>
